<compile_context>
chip_gen: v7x
topology: tpu7x:2x2x1
jax: 0.10.0
libtpu: 0.0.40
codegen_flags: <defaults>
</compile_context>

<pallas_src>
import jax
import jax.numpy as jnp
from jax.experimental import pallas as pl
from jax.experimental.pallas import tpu as pltpu

LANE = 128
SUBLANE = 8


def _round_up(n, m):
    return ((n + m - 1) // m) * m


def mlp_kernel(x_ref, w1_ref, b1_ref, w2_ref, b2_ref, o_ref):
    # Layer 1: bf16 operands, f32 accumulation on the MXU.
    h = jnp.dot(x_ref[...], w1_ref[...], preferred_element_type=jnp.float32)
    # Bias add + ReLU in f32 on the VPU.
    h = jnp.maximum(h + b1_ref[...], 0.0)
    # Layer 2 (small K/N: a handful of MXU passes; keep it fused, h stays in vregs).
    out = jnp.dot(h.astype(w2_ref.dtype), w2_ref[...],
                  preferred_element_type=jnp.float32)
    o_ref[...] = (out + b2_ref[...]).astype(o_ref.dtype)


def mlp_forward(x, w1, b1, w2, b2, *, tile_b=None):
    """Fused Linear->ReLU->Linear forward.

    x:  (B, D_in) f32
    w1: (D_in, H)   (transpose of PyTorch's (H, D_in))
    b1: (H,) or (1, H)
    w2: (H, C)      (transpose of PyTorch's (C, H))
    b2: (C,) or (1, C)
    Returns (B, C) in x.dtype.
    """
    B, D_in = x.shape
    H = w1.shape[1]
    C = w2.shape[1]

    # Lane-align every feature dim (removes masked loads / partial stores).
    d_pad = _round_up(D_in, LANE)   # 784 -> 896
    h_pad = _round_up(H, LANE)      # 32  -> 128
    c_pad = _round_up(C, LANE)      # 10  -> 128

    if tile_b is None:
        # Small batch: one grid step. Large batch: 256-row (MXU-width) tiles
        # so v6e/v7x systolic rows are full and v7x can shard across its 2 TCs.
        tile_b = _round_up(B, SUBLANE) if B <= 256 else 256
    tile_b = _round_up(tile_b, SUBLANE)
    b_pad = _round_up(B, tile_b)

    cdtype = jnp.bfloat16  # MXU operand dtype (f32 accumulation kept)

    xp = jnp.zeros((b_pad, d_pad), cdtype).at[:B, :D_in].set(x.astype(cdtype))
    w1p = jnp.zeros((d_pad, h_pad), cdtype).at[:D_in, :H].set(w1.astype(cdtype))
    w2p = jnp.zeros((h_pad, c_pad), cdtype).at[:H, :C].set(w2.astype(cdtype))
    b1p = jnp.zeros((1, h_pad), jnp.float32).at[:, :H].set(
        b1.reshape(1, -1).astype(jnp.float32))
    b2p = jnp.zeros((1, c_pad), jnp.float32).at[:, :C].set(
        b2.reshape(1, -1).astype(jnp.float32))

    grid = (b_pad // tile_b,)

    out_padded = pl.pallas_call(
        mlp_kernel,
        out_shape=jax.ShapeDtypeStruct((b_pad, c_pad), x.dtype),
        grid_spec=pltpu.PrefetchScalarGridSpec(
            num_scalar_prefetch=0,
            grid=grid,
            in_specs=[
                pl.BlockSpec((tile_b, d_pad), lambda i: (i, 0)),  # x tile
                pl.BlockSpec((d_pad, h_pad), lambda i: (0, 0)),   # W1 (resident)
                pl.BlockSpec((1, h_pad), lambda i: (0, 0)),       # b1
                pl.BlockSpec((h_pad, c_pad), lambda i: (0, 0)),   # W2 (resident)
                pl.BlockSpec((1, c_pad), lambda i: (0, 0)),       # b2
            ],
            out_specs=pl.BlockSpec((tile_b, c_pad), lambda i: (i, 0)),
        ),
        compiler_params=pltpu.CompilerParams(
            dimension_semantics=("parallel",)),
    )(xp, w1p, b1p, w2p, b2p)

    # Strip batch + lane padding outside the kernel (pure wrapper plumbing).
    return out_padded[:B, :C]


def reference_forward(x, w1, b1, w2, b2):
    h = jnp.maximum(x @ w1 + b1.reshape(1, -1), 0.0)
    return h @ w2 + b2.reshape(1, -1)


if __name__ == "__main__":
    # Shapes implied by MyNeuralNetwork: input_layer_size=784, small
    # hidden_size=32, num_classes=10, batch=16.
    B, D_IN, HIDDEN, NUM_CLASSES = 16, 784, 32, 10

    key = jax.random.PRNGKey(0)
    k_x, k_w1, k_b1, k_w2, k_b2 = jax.random.split(key, 5)

    x = jax.random.normal(k_x, (B, D_IN), dtype=jnp.float32)
    # PyTorch stores (out, in); we store the transpose so the kernel does x @ W.
    w1 = jax.random.normal(k_w1, (D_IN, HIDDEN), dtype=jnp.float32) * 0.02
    b1 = jax.random.normal(k_b1, (1, HIDDEN), dtype=jnp.float32) * 0.01
    w2 = jax.random.normal(k_w2, (HIDDEN, NUM_CLASSES), dtype=jnp.float32) * 0.02
    b2 = jax.random.normal(k_b2, (1, NUM_CLASSES), dtype=jnp.float32) * 0.01

    out = mlp_forward(x, w1, b1, w2, b2)
    out = jax.block_until_ready(out)

    ref = reference_forward(x, w1, b1, w2, b2)
    assert out.shape == (B, NUM_CLASSES)
    # bf16 MXU operands -> looser tolerance vs. the f32 reference.
    assert jnp.allclose(out, ref, atol=2e-2, rtol=2e-2), "mismatch vs reference"

    print("KERNEL_OK")
</pallas_src>

<mosaic_0001>
module attributes {stable_mosaic.version = 11 : i64} {
  func.func @mlp_kernel(%arg0: i32, %arg1: memref<16x896xbf16, #tpu.memory_space<vmem>>, %arg2: memref<896x128xbf16, #tpu.memory_space<vmem>>, %arg3: memref<1x128xf32, #tpu.memory_space<vmem>>, %arg4: memref<128x128xbf16, #tpu.memory_space<vmem>>, %arg5: memref<1x128xf32, #tpu.memory_space<vmem>>, %arg6: memref<16x128xf32, #tpu.memory_space<vmem>>) attributes {dimension_semantics = [#tpu.dimension_semantics<parallel>], iteration_bounds = array<i64: 1>, scalar_prefetch = 0 : i64, scratch_operands = 0 : i64, tpu.core_type = #tpu.core_type<tc>, window_params = [{transform_indices = @transform_0, window_bounds = array<i64: 16, 896>}, {pipeline_mode = #tpu.pipeline_mode<synchronous>, transform_indices = @transform_1, window_bounds = array<i64: 896, 128>}, {pipeline_mode = #tpu.pipeline_mode<synchronous>, transform_indices = @transform_2, window_bounds = array<i64: 1, 128>}, {pipeline_mode = #tpu.pipeline_mode<synchronous>, transform_indices = @transform_3, window_bounds = array<i64: 128, 128>}, {pipeline_mode = #tpu.pipeline_mode<synchronous>, transform_indices = @transform_4, window_bounds = array<i64: 1, 128>}, {transform_indices = @transform_5, window_bounds = array<i64: 16, 128>}]} {
    %c0 = arith.constant 0 : index
    %c0_0 = arith.constant 0 : index
    %0 = vector.load %arg1[%c0, %c0_0] : memref<16x896xbf16, #tpu.memory_space<vmem>>, vector<16x896xbf16>
    %c0_1 = arith.constant 0 : index
    %c0_2 = arith.constant 0 : index
    %1 = vector.load %arg2[%c0_1, %c0_2] : memref<896x128xbf16, #tpu.memory_space<vmem>>, vector<896x128xbf16>
    %cst = arith.constant dense<0.000000e+00> : vector<16x128xf32>
    %2 = tpu.matmul %0, %1, %cst {dimension_numbers = #tpu.dot_dimension_numbers<[1], [0], [0], [1], [0, 0, 1, 1], [], []>} : vector<16x896xbf16>, vector<896x128xbf16>, vector<16x128xf32> -> vector<16x128xf32>
    %c0_3 = arith.constant 0 : index
    %c0_4 = arith.constant 0 : index
    %3 = vector.load %arg3[%c0_3, %c0_4] : memref<1x128xf32, #tpu.memory_space<vmem>>, vector<1x128xf32>
    %4 = vector.broadcast %3 : vector<1x128xf32> to vector<16x128xf32>
    %5 = arith.addf %2, %4 : vector<16x128xf32>
    %cst_5 = arith.constant 0.000000e+00 : f32
    %6 = vector.broadcast %cst_5 : f32 to vector<16x128xf32>
    %7 = arith.maximumf %5, %6 : vector<16x128xf32>
    %8 = arith.truncf %7 : vector<16x128xf32> to vector<16x128xbf16>
    %c0_6 = arith.constant 0 : index
    %c0_7 = arith.constant 0 : index
    %9 = vector.load %arg4[%c0_6, %c0_7] : memref<128x128xbf16, #tpu.memory_space<vmem>>, vector<128x128xbf16>
    %cst_8 = arith.constant dense<0.000000e+00> : vector<16x128xf32>
    %10 = tpu.matmul %8, %9, %cst_8 {dimension_numbers = #tpu.dot_dimension_numbers<[1], [0], [0], [1], [0, 0, 1, 1], [], []>} : vector<16x128xbf16>, vector<128x128xbf16>, vector<16x128xf32> -> vector<16x128xf32>
    %c0_9 = arith.constant 0 : index
    %c0_10 = arith.constant 0 : index
    %11 = vector.load %arg5[%c0_9, %c0_10] : memref<1x128xf32, #tpu.memory_space<vmem>>, vector<1x128xf32>
    %12 = vector.broadcast %11 : vector<1x128xf32> to vector<16x128xf32>
    %13 = arith.addf %10, %12 : vector<16x128xf32>
    %c0_11 = arith.constant 0 : index
    %c0_12 = arith.constant 0 : index
    %14 = vector.load %arg6[%c0_11, %c0_12] : memref<16x128xf32, #tpu.memory_space<vmem>>, vector<16x128xf32>
    tpu.vector_store %arg6[%c0_11, %c0_12], %13 {strides = array<i32>} : memref<16x128xf32, #tpu.memory_space<vmem>>, vector<16x128xf32>,
    return
  }
  func.func @transform_0(%arg0: i32) -> (i32, i32) {
    %c0_i32 = arith.constant 0 : i32
    %c0_i32_0 = arith.constant 0 : i32
    return %arg0, %c0_i32 : i32, i32
  }
  func.func @transform_1(%arg0: i32) -> (i32, i32) {
    %c0_i32 = arith.constant 0 : i32
    %c0_i32_0 = arith.constant 0 : i32
    %c0_i32_1 = arith.constant 0 : i32
    return %c0_i32, %c0_i32_0 : i32, i32
  }
  func.func @transform_2(%arg0: i32) -> (i32, i32) {
    %c0_i32 = arith.constant 0 : i32
    %c0_i32_0 = arith.constant 0 : i32
    %c0_i32_1 = arith.constant 0 : i32
    return %c0_i32, %c0_i32_0 : i32, i32
  }
  func.func @transform_3(%arg0: i32) -> (i32, i32) {
    %c0_i32 = arith.constant 0 : i32
    %c0_i32_0 = arith.constant 0 : i32
    %c0_i32_1 = arith.constant 0 : i32
    return %c0_i32, %c0_i32_0 : i32, i32
  }
  func.func @transform_4(%arg0: i32) -> (i32, i32) {
    %c0_i32 = arith.constant 0 : i32
    %c0_i32_0 = arith.constant 0 : i32
    %c0_i32_1 = arith.constant 0 : i32
    return %c0_i32, %c0_i32_0 : i32, i32
  }
  func.func @transform_5(%arg0: i32) -> (i32, i32) {
    %c0_i32 = arith.constant 0 : i32
    %c0_i32_0 = arith.constant 0 : i32
    return %arg0, %c0_i32 : i32, i32
  }
}

</mosaic_0001>

<bundles_post_ra>
// kernel: tpu_custom_call.1
= control target key start
LH: loop header
LB: loop body
LE: loop exit
PB: predicated region body
PF: predicated region fallthrough
CT: control target
= control target key end

     0   :  { %10 = vsyncpa [#allocation3], 0  ;;  %s1360_s0 = inlined_call_operand.hbm [shape: bf16[16,896], index: 0, kind: input, shape index: {}]   ;;  %s1361_s1 = inlined_call_operand.hbm [shape: bf16[896,128], index: 1, kind: input, shape index: {}]   ;;  %s1362_s2 = inlined_call_operand.vmem [shape: f32[1,128], index: 2, kind: input, shape index: {}]   ;;  %s1363_s3 = inlined_call_operand.hbm [shape: bf16[128,128], index: 3, kind: input, shape index: {}]   ;;  %s1364_s4 = inlined_call_operand.vmem [shape: f32[1,128], index: 4, kind: input, shape index: {}]   ;;  %s1365_s5 = inlined_call_operand.hbm [shape: f32[16,128], index: 5, kind: output, shape index: {}]  }
   0x1   :  { %11 = vsyncpa [#allocation6], 0 }
   0x2   :  { %12 = vsyncpa [#allocation4], 0  ;;  %s1238_s18 = smov [#allocation5]   ;;  %s1144_s22 = scalar_lea.hbm %s1361_s1, 7168 }
   0x3   :  { %s30_s19 = sshll.u32 %s1238_s18, 4  ;;  %p1145_p0 = scmp.ne.s32.totalorder %s1361_s1, %s1144_s22  ;;  %s31_s19 = int_to_ptr.vmem [resolvable:$true] %s30_s19 }
   0x4   :  { %p1148_p1 = scmp.lt.u32.totalorder %s1144_s22, %s1361_s1 }
   0x6   :  { %p1150_p2 = pnand %p1148_p1, %p1145_p0 }
   0x8   :  { %1153 = shalt.err (!%p1150_p2)
}
   0x9   :  { %s1154_s27 = scalar_lea.vmem %s31_s19, 7168  ;;  %p1159_p4 = scmp.lt.s32.totalorder %s31_s19, %s31_s19 }
   0xa   :  { %p1155_p3 = scmp.ne.s32.totalorder %s31_s19, %s1154_s27  ;;  %p1160_p5 = scmp.lt.s32.totalorder %s1154_s27, %s1154_s27 }
   0xc   :  { %p1161_p6 = por %p1160_p5, %p1159_p4 }
   0xe   :  { %p1162_p7 = pnand %p1161_p6, %p1155_p3 }
  0x10   :  { %1165 = shalt.err (!%p1162_p7)
}
  0x11   :  { %s1239_s28 = smov 64   ;;  %s1240_s29 = smov 4  }
  0x12   :  { %36 = dma.hbm_to_vmem [thread:$0]  %s1361_s1, 7168, %s31_s19, [#allocation6], %s1239_s28, %s1239_s28, %s1240_s29  }
  0x13   :  { %s1241_s7 = smov [#allocation2]   ;;  %s1166_s11 = scalar_lea.hbm %s1360_s0, 896 }
  0x14   :  { %s18_s8 = sshll.u32 %s1241_s7, 4  ;;  %p1167_p8 = scmp.ne.s32.totalorder %s1360_s0, %s1166_s11  ;;  %s19_s8 = int_to_ptr.vmem [resolvable:$true] %s18_s8 }
  0x15   :  { %p1170_p9 = scmp.lt.u32.totalorder %s1166_s11, %s1360_s0 }
  0x17   :  { %p1172_p10 = pnand %p1170_p9, %p1167_p8 }
  0x19   :  { %1175 = shalt.err (!%p1172_p10)
}
  0x1a   :  { %s1176_s16 = scalar_lea.vmem %s19_s8, 896  ;;  %p1181_p12 = scmp.lt.s32.totalorder %s19_s8, %s19_s8 }
  0x1b   :  { %p1177_p11 = scmp.ne.s32.totalorder %s19_s8, %s1176_s16  ;;  %p1182_p13 = scmp.lt.s32.totalorder %s1176_s16, %s1176_s16 }
  0x1d   :  { %p1183_p0 = por %p1182_p13, %p1181_p12 }
  0x1f   :  { %p1184_p1 = pnand %p1183_p0, %p1177_p11 }
  0x21   :  { %1187 = shalt.err (!%p1184_p1)
}
  0x22   :  { %s1242_s1 = smov 448   ;;  %s1243_s17 = smov 28  }
  0x23   :  { %24 = dma.hbm_to_vmem [thread:$0]  %s1360_s0, 896, %s19_s8, [#allocation3], %s1242_s1, %s1242_s1, %s1243_s17  }
  0x24   :  { %s1244_s20 = smov [#allocation7]   ;;  %s1188_s24 = scalar_lea.hbm %s1363_s3, 1024 }
  0x25   :  { %s44_s21 = sshll.u32 %s1244_s20, 4  ;;  %p1189_p2 = scmp.ne.s32.totalorder %s1363_s3, %s1188_s24  ;;  %s45_s21 = int_to_ptr.vmem [resolvable:$true] %s44_s21 }
  0x26   :  { %p1192_p3 = scmp.lt.u32.totalorder %s1188_s24, %s1363_s3 }
  0x28   :  { %p1194_p4 = pnand %p1192_p3, %p1189_p2 }
  0x2a   :  { %1197 = shalt.err (!%p1194_p4)
}
  0x2b   :  { %s1198_s6 = scalar_lea.vmem %s45_s21, 1024  ;;  %p1203_p6 = scmp.lt.s32.totalorder %s45_s21, %s45_s21 }
  0x2c   :  { %p1199_p5 = scmp.ne.s32.totalorder %s45_s21, %s1198_s6  ;;  %p1204_p7 = scmp.lt.s32.totalorder %s1198_s6, %s1198_s6 }
  0x2e   :  { %p1205_p8 = por %p1204_p7, %p1203_p6 }
  0x30   :  { %p1206_p9 = pnand %p1205_p8, %p1199_p5 }
  0x32   :  { %1209 = shalt.err (!%p1206_p9)
}
  0x33   :  { %50 = dma.hbm_to_vmem [thread:$0]  %s1363_s3, 1024, %s45_s21, [#allocation6], %s1239_s28, %s1239_s28, %s1240_s29  }
  0x34   :  { %1232 = dma.done.wait [#allocation3], 896  }
  0x35   :  { %1233 = vsyncadd [#allocation3], 4294966400 }
  0x36   :  { %1234 = dma.done.wait [#allocation6], 8192  }
  0x37   :  { %1235 = vsyncadd [#allocation6], 4294959104  ;;  %v1070_v0 = vld [vmem:[#allocation5 + $0x40] sm:$0xff]   ;;  %v1074_v4 = vld [vmem:[#allocation5 + $0x48] sm:$0xff]   ;;  %v1245_v38 = vmov 0.0   ;;  %vm1246_vm0 = vmmov 0  }
  0x38   :  { %v1071_v1 = vld [vmem:[#allocation5] sm:$0xff]   ;;  %934 = vmatprep.subr.bf16.mxu0 %v1070_v0  ;;  %v1075_v5 = vld [vmem:[#allocation5 + $0x8] sm:$0xff]   ;;  %v1078_v8 = vld [vmem:[#allocation5 + $0x50] sm:$0xff]   ;;  %s1247_s8 = smov [#allocation8]  }
  0x39   :  { %v1072_v2 = vld [vmem:[#allocation5 + $0xc0] sm:$0xff]   ;;  %935 = vmatpush3.bf16.msra.mxu0 %v1071_v1  ;;  %v1076_v6 = vld [vmem:[#allocation5 + $0xc8] sm:$0xff]   ;;  %v1079_v9 = vld [vmem:[#allocation5 + $0x10] sm:$0xff]   ;;  %s848_s9 = sshll.u32 %s1247_s8, 4  ;;  %s849_s9 = int_to_ptr.vmem [resolvable:$true] %s848_s9 }
  0x3a   :  { %v1073_v3 = vld [vmem:[#allocation5 + $0x80] sm:$0xff]   ;;  %956 = vmatprep.subr.bf16.mxu1 %v1072_v2  ;;  %936 = vmatprep.subr.bf16.mxu0 %v1074_v4  ;;  %v1077_v7 = vld [vmem:[#allocation5 + $0x88] sm:$0xff]   ;;  %v1080_v10 = vld [vmem:[#allocation5 + $0xd0] sm:$0xff]   ;;  %s1210_s10 = scalar_lea.vmem %s849_s9, 256  ;;  %p1215_p11 = scmp.lt.s32.totalorder %s849_s9, %s849_s9 }
  0x3b   :  { %957 = vmatpush3.bf16.msra.mxu1 %v1073_v3  ;;  %v1081_v11 = vld [vmem:[#allocation5 + $0x90] sm:$0xff]   ;;  %v1082_v12 = vld [vmem:[#allocation5 + $0x58] sm:$0xff]   ;;  %v1086_v16 = vld [vmem:[#allocation5 + $0x60] sm:$0xff]   ;;  %p1211_p10 = scmp.ne.s32.totalorder %s849_s9, %s1210_s10  ;;  %p1216_p12 = scmp.lt.s32.totalorder %s1210_s10, %s1210_s10 }
  0x3c   :  { %958 = vmatprep.subr.bf16.mxu1 %v1076_v6  ;;  %v1083_v13 = vld [vmem:[#allocation5 + $0x18] sm:$0xff]   ;;  %v1087_v17 = vld [vmem:[#allocation5 + $0x20] sm:$0xff]   ;;  %v1090_v20 = vld [vmem:[#allocation5 + $0x68] sm:$0xff]  }
  0x3d   :  { %937 = vmatpush3.bf16.msra.mxu0 %v1075_v5  ;;  %v1084_v14 = vld [vmem:[#allocation5 + $0xd8] sm:$0xff]   ;;  %v1088_v18 = vld [vmem:[#allocation5 + $0xe0] sm:$0xff]   ;;  %v1091_v21 = vld [vmem:[#allocation5 + $0x28] sm:$0xff]   ;;  %p1217_p13 = por %p1216_p12, %p1215_p11 }
  0x3e   :  { %938 = vmatprep.subr.bf16.mxu0 %v1078_v8  ;;  %v1085_v15 = vld [vmem:[#allocation5 + $0x98] sm:$0xff]   ;;  %v1089_v19 = vld [vmem:[#allocation5 + $0xa0] sm:$0xff]   ;;  %v1092_v22 = vld [vmem:[#allocation5 + $0xe8] sm:$0xff]  }
  0x3f   :  { %959 = vmatpush3.bf16.msra.mxu1 %v1077_v7  ;;  %v1093_v23 = vld [vmem:[#allocation5 + $0xa8] sm:$0xff]   ;;  %v1094_v24 = vld [vmem:[#allocation5 + $0x70] sm:$0xff]   ;;  %v1098_v28 = vld [vmem:[#allocation5 + $0x78] sm:$0xff]   ;;  %p1218_p0 = pnand %p1217_p13, %p1211_p10 }
  0x40   :  { %960 = vmatprep.subr.bf16.mxu1 %v1080_v10  ;;  %v1095_v25 = vld [vmem:[#allocation5 + $0x30] sm:$0xff]   ;;  %v1099_v29 = vld [vmem:[#allocation5 + $0x38] sm:$0xff]   ;;  %v1101_v31 = vld [vmem:[#allocation2] ss:$28 sps:$4 sm:$0xff]  }
  0x41   :  { %939 = vmatpush3.bf16.msra.mxu0 %v1079_v9  ;;  %v1096_v26 = vld [vmem:[#allocation5 + $0xf0] sm:$0xff]   ;;  %v1100_v30 = vld [vmem:[#allocation5 + $0xf8] sm:$0xff]   ;;  %v1103_v32 = vld [vmem:[#allocation2 + $0x4] ss:$28 sps:$4 sm:$0xff]  }
  0x42   :  { %940 = vmatprep.subr.bf16.mxu0 %v1082_v12  ;;  %v1097_v27 = vld [vmem:[#allocation5 + $0xb0] sm:$0xff]   ;;  %v1104_v33 = vld [vmem:[#allocation5 + $0xb8] sm:$0xff]   ;;  %594 = vmatprep.mubr.bf16.mxu0 %v1103_v32  ;;  %v1105_v34 = vld [vmem:[#allocation5 + $0x140] sm:$0xff]  }
  0x43   :  { %961 = vmatpush3.bf16.msra.mxu1 %v1081_v11  ;;  %v1106_v35 = vld [vmem:[#allocation2 + $0x8] ss:$28 sps:$4 sm:$0xff]   ;;  %v1109_v37 = vld [vmem:[#allocation5 + $0x100] sm:$0xff]   ;;  %v1117_v46 = vld [vmem:[#allocation5 + $0x158] sm:$0xff]  }
  0x44   :  { %962 = vmatprep.subr.bf16.mxu1 %v1084_v14  ;;  %v1108_v36 = vld [vmem:[#allocation2 + $0xc] ss:$28 sps:$4 sm:$0xff]   ;;  %v1110_v39 = vld [vmem:[#allocation5 + $0x180] sm:$0xff]   ;;  %v1111_v40 = vld [vmem:[#allocation5 + $0x148] sm:$0xff]  }
  0x45   :  { %941 = vmatpush3.bf16.msra.mxu0 %v1083_v13  ;;  %635 = vmatprep.mubr.bf16.mxu1 %v1108_v36  ;;  %v1112_v41 = vld [vmem:[#allocation5 + $0x108] sm:$0xff]   ;;  %v1114_v43 = vld [vmem:[#allocation5 + $0x150] sm:$0xff]   ;;  %v1118_v47 = vld [vmem:[#allocation5 + $0x118] sm:$0xff]  }
  0x46   :  { %942 = vmatprep.subr.bf16.mxu0 %v1086_v16  ;;  %v1113_v42 = vld [vmem:[#allocation5 + $0x188] sm:$0xff]   ;;  %v1115_v44 = vld [vmem:[#allocation5 + $0x110] sm:$0xff]   ;;  %v1119_v48 = vld [vmem:[#allocation5 + $0x198] sm:$0xff]  }
  0x47   :  { %963 = vmatpush3.bf16.msra.mxu1 %v1085_v15  ;;  %v1116_v45 = vld [vmem:[#allocation5 + $0x190] sm:$0xff]   ;;  %v1120_v49 = vld [vmem:[#allocation5 + $0x160] sm:$0xff]   ;;  %v1123_v52 = vld [vmem:[#allocation5 + $0x168] sm:$0xff]  }
  0x48   :  { %964 = vmatprep.subr.bf16.mxu1 %v1088_v18  ;;  %v1121_v50 = vld [vmem:[#allocation5 + $0x120] sm:$0xff]   ;;  %v1124_v53 = vld [vmem:[#allocation5 + $0x128] sm:$0xff]   ;;  %v1126_v55 = vld [vmem:[#allocation5 + $0x170] sm:$0xff]  }
  0x49   :  { %943 = vmatpush3.bf16.msra.mxu0 %v1087_v17  ;;  %v1122_v51 = vld [vmem:[#allocation5 + $0x1a0] sm:$0xff]   ;;  %v1125_v54 = vld [vmem:[#allocation5 + $0x1a8] sm:$0xff]   ;;  %v1127_v56 = vld [vmem:[#allocation5 + $0x130] sm:$0xff]  }
  0x4a   :  { %944 = vmatprep.subr.bf16.mxu0 %v1090_v20  ;;  %v1128_v57 = vld [vmem:[#allocation5 + $0x1b0] sm:$0xff]   ;;  %v1133_v58 = vld [vmem:[#allocation2 + $0x14] ss:$28 sps:$4 sm:$0xff]   ;;  %v1136_v0 = vld [vmem:[#allocation7] sm:$0xff]  }
  0x4b   :  { %965 = vmatpush3.bf16.msra.mxu1 %v1089_v19  ;;  %v1129_v59 = vld [vmem:[#allocation5 + $0x178] sm:$0xff]   ;;  %v1137_v1 = vld [vmem:[#allocation7 + $0x8] sm:$0xff]   ;;  %v1138_v2 = vld [vmem:[#allocation7 + $0x10] sm:$0xff]  }
  0x4c   :  { %966 = vmatprep.subr.bf16.mxu1 %v1092_v22  ;;  %v1130_v60 = vld [vmem:[#allocation5 + $0x138] sm:$0xff]   ;;  %v1140_v4 = vld [vmem:[#allocation7 + $0x20] sm:$0xff]   ;;  %v1141_v5 = vld [vmem:[#allocation7 + $0x28] sm:$0xff]  }
  0x4d   :  { %945 = vmatpush3.bf16.msra.mxu0 %v1091_v21  ;;  %v1134_v61 = vld [vmem:[#allocation5 + $0x1b8] sm:$0xff]   ;;  %v1142_v6 = vld [vmem:[#allocation7 + $0x30] sm:$0xff]   ;;  %v861_v9 = vld [vmem:[%s1362_s2] ss:$0 sm:$0xff] }
  0x4e   :  { %946 = vmatprep.subr.bf16.mxu0 %v1094_v24  ;;  %v1131_v62 = vld [vmem:[#allocation2 + $0x10] ss:$28 sps:$4 sm:$0xff]   ;;  %v1135_v63 = vld [vmem:[#allocation2 + $0x18] ss:$28 sps:$4 sm:$0xff]  }
  0x4f   :  { %967 = vmatpush3.bf16.msra.mxu1 %v1093_v23  ;;  %v1139_v3 = vld [vmem:[#allocation7 + $0x18] sm:$0xff]  }
  0x50   :  { %968 = vmatprep.subr.bf16.mxu1 %v1096_v26  ;;  %v1143_v7 = vld [vmem:[#allocation7 + $0x38] sm:$0xff]  }
  0x51   :  { %947 = vmatpush3.bf16.msra.mxu0 %v1095_v25 }
  0x52   :  { %948 = vmatprep.subr.bf16.mxu0 %v1098_v28 }
  0x53   :  { %969 = vmatpush3.bf16.msra.mxu1 %v1097_v27 }
  0x54   :  { %970 = vmatprep.subr.bf16.mxu1 %v1100_v30 }
  0x55   :  { %949 = vmatpush3.bf16.msra.mxu0 %v1099_v29 }
  0x56   :  { %978 = vmatprep.subr.bf16.mxu0 %v1105_v34 }
  0x57   :  { %971 = vmatpush3.bf16.msra.mxu1 %v1104_v33 }
  0x58   :  { %595 = vmatmul.mubr.bf16.vlgmr.msra.gmra.mrb[0].mxu0 %v1101_v31  ;;  %1018 = vmatprep.subr.bf16.mxu1 %v1245_v38 }
  0x59   :  { %979 = vmatpush3.bf16.msra.mxu0 %v1109_v37  ;;  %676 = vmatprep.mubr.bf16.mxu0 %v1133_v58 }
  0x5a   :  { %636 = vmatmul.mubr.bf16.vlgmr.msra.gmra.mrb[0].mxu1 %v1106_v35  ;;  %980 = vmatprep.subr.bf16.mxu0 %v1111_v40 }
  0x5b   :  { %1019 = vmatpush3.bf16.msra.mxu1 %v1110_v39  ;;  %1034 = vmatprep.mubr.msk.bf16.mxu1 %vm1246_vm0, %v1245_v38 }
  0x5c   :  { %1020 = vmatprep.subr.bf16.mxu1 %v1245_v38 }
  0x5d   :  { %981 = vmatpush3.bf16.msra.mxu0 %v1112_v41 }
  0x5e   :  { %982 = vmatprep.subr.bf16.mxu0 %v1114_v43 }
  0x5f   :  { %1021 = vmatpush3.bf16.msra.mxu1 %v1113_v42  ;;  %v925_v42 = vld [vmem:[%s1364_s4] ss:$0 sm:$0xff] }
  0x60   :  { %1022 = vmatprep.subr.bf16.mxu1 %v1245_v38 }
  0x61   :  { %983 = vmatpush3.bf16.msra.mxu0 %v1115_v44 }
  0x62   :  { %984 = vmatprep.subr.bf16.mxu0 %v1117_v46 }
  0x63   :  { %1023 = vmatpush3.bf16.msra.mxu1 %v1116_v45 }
  0x64   :  { %1024 = vmatprep.subr.bf16.mxu1 %v1245_v38 }
  0x65   :  { %985 = vmatpush3.bf16.msra.mxu0 %v1118_v47 }
  0x66   :  { %986 = vmatprep.subr.bf16.mxu0 %v1120_v49 }
  0x67   :  { %1025 = vmatpush3.bf16.msra.mxu1 %v1119_v48 }
  0x68   :  { %1026 = vmatprep.subr.bf16.mxu1 %v1245_v38 }
  0x69   :  { %987 = vmatpush3.bf16.msra.mxu0 %v1121_v50 }
  0x6a   :  { %988 = vmatprep.subr.bf16.mxu0 %v1123_v52 }
  0x6b   :  { %1027 = vmatpush3.bf16.msra.mxu1 %v1122_v51 }
  0x6c   :  { %1028 = vmatprep.subr.bf16.mxu1 %v1245_v38 }
  0x6d   :  { %989 = vmatpush3.bf16.msra.mxu0 %v1124_v53 }
  0x6e   :  { %990 = vmatprep.subr.bf16.mxu0 %v1126_v55 }
  0x6f   :  { %1029 = vmatpush3.bf16.msra.mxu1 %v1125_v54 }
  0x70   :  { %1030 = vmatprep.subr.bf16.mxu1 %v1245_v38 }
  0x71   :  { %991 = vmatpush3.bf16.msra.mxu0 %v1127_v56 }
  0x72   :  { %992 = vmatprep.subr.bf16.mxu0 %v1129_v59 }
  0x73   :  { %1031 = vmatpush3.bf16.msra.mxu1 %v1128_v57 }
  0x74   :  { %1032 = vmatprep.subr.bf16.mxu1 %v1245_v38 }
  0x75   :  { %993 = vmatpush3.bf16.msra.mxu0 %v1130_v60 }
  0x76   :  { %1038 = vmatprep.subr.bf16.mxu0 %v1245_v38 }
  0x77   :  { %1033 = vmatpush3.bf16.msra.mxu1 %v1134_v61 }
  0x78   :  { %677 = vmatmul.mubr.bf16.vlgmr.msra.gmra.mrb[4].mxu0 %v1131_v62 }
  0x79   :  { %1054 = vmatprep.mubr.msk.bf16.mxu0 %vm1246_vm0, %v1245_v38  ;;  %1039 = vmatpush3.bf16.msra.mxu0 %v1136_v0 }
  0x7a   :  { %1035 = vmatmul.mubr.bf16.vlgmr.msra.gmra.mrb[4].mxu1 %v1135_v63  ;;  %1040 = vmatprep.subr.bf16.mxu0 %v1245_v38 }
  0x7d   :  { %1041 = vmatpush3.bf16.msra.mxu0 %v1137_v1 }
  0x7e   :  { %1042 = vmatprep.subr.bf16.mxu0 %v1245_v38 }
  0x81   :  { %1043 = vmatpush3.bf16.msra.mxu0 %v1138_v2 }
  0x82   :  { %1044 = vmatprep.subr.bf16.mxu0 %v1245_v38 }
  0x85   :  { %1045 = vmatpush3.bf16.msra.mxu0 %v1139_v3 }
  0x86   :  { %1046 = vmatprep.subr.bf16.mxu0 %v1245_v38 }
  0x89   :  { %1047 = vmatpush3.bf16.msra.mxu0 %v1140_v4 }
  0x8a   :  { %1048 = vmatprep.subr.bf16.mxu0 %v1245_v38 }
  0x8d   :  { %1049 = vmatpush3.bf16.msra.mxu0 %v1141_v5 }
  0x8e   :  { %1050 = vmatprep.subr.bf16.mxu0 %v1245_v38 }
  0x91   :  { %1051 = vmatpush3.bf16.msra.mxu0 %v1142_v6 }
  0x92   :  { %1052 = vmatprep.subr.bf16.mxu0 %v1245_v38 }
  0x95   :  { %1053 = vmatpush3.bf16.msra.mxu0 %v1143_v7 }
 0x12b   :  { %v950_v8 = vpop.f32.mrb[0].mxu0 }
 0x12c   :  { %v951_v10 = vpop.f32.mrb[1].mxu0 }
 0x12d   :  { %v952_v11 = vadd.f32 %v951_v10, %v950_v8  ;;  %v953_v12 = vpop.f32.mrb[2].mxu0  ;;  %v972_v13 = vpop.f32.mrb[0].mxu1 }
 0x12e   :  { %v954_v14 = vpop.f32.mrb[3].mxu0  ;;  %v973_v17 = vpop.f32.mrb[1].mxu1 }
 0x12f   :  { %v597_v15 = vadd.f32 %v952_v11, %v861_v9  ;;  %v955_v16 = vadd.f32 %v954_v14, %v953_v12  ;;  %v974_v18 = vadd.f32 %v973_v17, %v972_v13  ;;  %v975_v19 = vpop.f32.mrb[2].mxu1 }
 0x130   :  { %v976_v21 = vpop.f32.mrb[3].mxu1 }
 0x131   :  { %v600_v20 = vadd.f32 %v955_v16, %v861_v9  ;;  %v638_v22 = vadd.f32 %v974_v18, %v597_v15  ;;  %v977_v23 = vadd.f32 %v976_v21, %v975_v19 }
 0x133   :  { %v641_v24 = vadd.f32 %v977_v23, %v600_v20 }
 0x14b   :  { %v994_v25 = vpop.f32.mrb[4].mxu0 }
 0x14c   :  { %v995_v26 = vpop.f32.mrb[5].mxu0 }
 0x14d   :  { %v719_v27 = vpop.f32.mrb[4].mxu1  ;;  %v996_v28 = vadd.f32 %v995_v26, %v994_v25  ;;  %v997_v29 = vpop.f32.mrb[6].mxu0 }
 0x14e   :  { %v1036_v30 = vpop.f32.mrb[5].mxu1  ;;  %v998_v31 = vpop.f32.mrb[7].mxu0 }
 0x14f   :  { %v722_v32 = vpop.f32.mrb[6].mxu1  ;;  %v679_v33 = vadd.f32 %v996_v28, %v638_v22  ;;  %v999_v34 = vadd.f32 %v998_v31, %v997_v29 }
 0x150   :  { %v1037_v35 = vpop.f32.mrb[7].mxu1 }
 0x151   :  { %v720_v36 = vadd.f32 %v719_v27, %v679_v33  ;;  %v682_v37 = vadd.f32 %v999_v34, %v641_v24 }
 0x153   :  { %v723_v38 = vadd.f32 %v722_v32, %v682_v37  ;;  %v726_v39 = vmax.f32 %v720_v36, 0.0 }
 0x155   :  { %v727_v40 = vmax.f32 %v723_v38, 0.0 }
 0x157   :  { %v728_v41 = vpack.c.bf16 %v727_v40, %v726_v39 }
 0x159   :  { %1055 = vmatmul.mubr.bf16.vlgmr.msra.gmra.mrb[8].mxu0 %v728_v41 }
 0x22c   :  { %v834_v43 = vpop.f32.mrb[8].mxu0 }
 0x22d   :  { %v835_v44 = vadd.f32 %v925_v42, %v834_v43  ;;  %v1056_v45 = vpop.f32.mrb[9].mxu0 }
 0x22e   :  { %v837_v46 = vpop.f32.mrb[10].mxu0 }
 0x22f   :  { %841 = vst [vmem:[#allocation8] sm:$0xff] %v835_v44  ;;  %v838_v47 = vadd.f32 %v925_v42, %v837_v46  ;;  %v1057_v48 = vpop.f32.mrb[11].mxu0 }
 0x231   :  { %842 = vst [vmem:[#allocation8 + $0x8] sm:$0xff] %v838_v47 }
 0x232   :  { %1221 = shalt.err (!%p1218_p0)
}
 0x233   :  { %s1222_s12 = scalar_lea.hbm %s1365_s5, 256 }
 0x234   :  { %p1223_p1 = scmp.ne.s32.totalorder %s1365_s5, %s1222_s12  ;;  %p1226_p2 = scmp.lt.u32.totalorder %s1222_s12, %s1365_s5 }
 0x236   :  { %p1228_p3 = pnand %p1226_p2, %p1223_p1 }
 0x238   :  { %1231 = shalt.err (!%p1228_p3)
}
 0x239   :  { %s1248_s1 = smov 128   ;;  %s1249_s17 = smov 8  }
 0x23a   :  { %854 = dma.vmem_to_hbm [thread:$0]  %s849_s9, 256, %s1365_s5, [#allocation4], %s1248_s1, %s1248_s1, %s1249_s17  }
 0x23b   :  { %1236 = dma.done.wait [#allocation4], 256  }
 0x23c   :  { %1237 = vsyncadd [#allocation4], 4294967040 }
 0x23d   :  { %858 = vsyncpa [#allocation3], 1 }
 0x23e   :  { %859 = vsyncpa [#allocation6], 1 }
 0x23f   :  { %860 = vsyncpa [#allocation4], 1 }

</bundles_post_ra>
